<compile_context>
chip_gen: v5e
topology: v5e:2x2
jax: 0.10.0
libtpu: 0.0.40
codegen_flags: <defaults>
</compile_context>

<pallas_src>
import jax
import jax.numpy as jnp
from jax.experimental import pallas as pl
from jax.experimental.pallas import tpu as pltpu


def _temp_scale_kernel(temp_ref, logit_ref, out_ref):
    # temp_ref: (1, 1) f32 scalar in SMEM.  The scalar reciprocal is on the
    # scalar unit and fully hidden under the tile DMA; the hot path is one VPU
    # multiply per vreg of the logits tile.
    inv_t = 1.0 / temp_ref[0, 0]
    x = logit_ref[...]
    out_ref[...] = (x.astype(jnp.float32) * inv_t).astype(out_ref.dtype)


def _sublane_multiple(dtype) -> int:
    # Minimum sublane tile: 8 for 4-byte dtypes, 16 for 2-byte, 32 for 1-byte.
    itemsize = jnp.dtype(dtype).itemsize
    return max(8, 32 // max(1, itemsize))


def temp_scale(
    logit: jax.Array,
    temperature: jax.Array,
    *,
    target_block_bytes: int = 4 * 1024 * 1024,   # ~4 MiB per block
    vmem_limit_bytes: int = 32 * 1024 * 1024,    # 4x block (dbl-buffered in+out) fits; safe on v5e/v6e/v7x
) -> jax.Array:
    """Divide logits by a scalar temperature using a Pallas TPU kernel."""
    orig_shape = logit.shape
    dtype = logit.dtype
    itemsize = jnp.dtype(dtype).itemsize
    sub = _sublane_multiple(dtype)

    # --- Flatten to 2D [rows, L]; keep the class dim last (maps to lanes). ---
    if logit.ndim == 1:
        work = logit.reshape(1, -1)
    else:
        work = logit.reshape(-1, orig_shape[-1])
    rows, L = work.shape
    total = rows * L

    # --- If the lane dim is not 128-aligned, try to fold rows into a
    #     lane-dense slab (pure layout plumbing for an elementwise op). ---
    if L % 128 != 0:
        folded_L = None
        for k in range(64, 0, -1):          # largest 128*k (<= 8192) dividing total
            cand = 128 * k
            if total % cand == 0:
                folded_L = cand
                break
        if folded_L is not None:
            L = folded_L
            rows = total // L
            work = work.reshape(rows, L)

    # --- Choose block shape by VMEM budget (double-buffered in+out ~= 4x block). ---
    if L % 128 == 0:
        max_cols = max(128, (target_block_bytes // (sub * itemsize)) // 128 * 128)
        block_cols = min(L, max_cols)
    else:
        block_cols = L                       # full dim: only legal non-128-aligned option

    bytes_per_row = max(1, block_cols * itemsize)
    max_rows = max(sub, (target_block_bytes // bytes_per_row) // sub * sub)
    block_rows = min(rows, max_rows)         # full dim if small, else multiple of `sub`

    grid = (pl.cdiv(rows, block_rows), pl.cdiv(L, block_cols))

    temp_smem = temperature.reshape(1, 1).astype(jnp.float32)

    out = pl.pallas_call(
        _temp_scale_kernel,
        out_shape=jax.ShapeDtypeStruct((rows, L), dtype),
        grid_spec=pl.GridSpec(
            grid=grid,
            in_specs=[
                pl.BlockSpec(memory_space=pltpu.SMEM),                     # temperature scalar
                pl.BlockSpec((block_rows, block_cols), lambda i, j: (i, j)),  # logits tile
            ],
            out_specs=pl.BlockSpec((block_rows, block_cols), lambda i, j: (i, j)),
        ),
        compiler_params=pltpu.CompilerParams(
            dimension_semantics=("parallel", "parallel"),
            vmem_limit_bytes=vmem_limit_bytes,
        ),
    )(temp_smem, work)

    return out.reshape(orig_shape)


class TempScaleParamsPallas:
    """JAX/Pallas equivalent of the PyTorch TempScaleParams module."""

    def __init__(self):
        # nn.Parameter(torch.tensor([1.5])) -> deterministic init.
        self.temperature = jnp.array([1.5], dtype=jnp.float32)

    def __call__(self, logit):
        return temp_scale(logit, self.temperature)


if __name__ == "__main__":
    key = jax.random.PRNGKey(0)
    model = TempScaleParamsPallas()

    # Small, lane-aligned logits: batch=8, num_classes=128.
    logit = jax.random.normal(key, (8, 128), dtype=jnp.float32)
    out = jax.block_until_ready(model(logit))
    ref = logit / model.temperature[0]
    assert out.shape == logit.shape and out.dtype == logit.dtype
    assert jnp.allclose(out, ref, rtol=1e-6, atol=1e-6)

    # Extra check: non-128-aligned class dim (exercises full-dim block path).
    logit2 = jax.random.normal(jax.random.PRNGKey(1), (4, 10), dtype=jnp.float32)
    out2 = jax.block_until_ready(model(logit2))
    ref2 = logit2 / model.temperature[0]
    assert jnp.allclose(out2, ref2, rtol=1e-6, atol=1e-6)

    print("KERNEL_OK")
</pallas_src>

<mosaic_0001>
module attributes {stable_mosaic.version = 11 : i64} {
  func.func @_temp_scale_kernel(%arg0: i32, %arg1: i32, %arg2: memref<1x1xf32, #tpu.memory_space<smem>>, %arg3: memref<8x128xf32, #tpu.memory_space<vmem>>, %arg4: memref<8x128xf32, #tpu.memory_space<vmem>>) attributes {dimension_semantics = [#tpu.dimension_semantics<parallel>, #tpu.dimension_semantics<parallel>], iteration_bounds = array<i64: 1, 1>, scalar_prefetch = 0 : i64, scratch_operands = 0 : i64, tpu.core_type = #tpu.core_type<tc>, window_params = [{transform_indices = @transform_0, window_bounds = array<i64: 1, 1>}, {transform_indices = @transform_1, window_bounds = array<i64: 8, 128>}, {transform_indices = @transform_2, window_bounds = array<i64: 8, 128>}]} {
    %c0 = arith.constant 0 : index
    %c0_0 = arith.constant 0 : index
    %0 = memref.load %arg2[%c0, %c0_0] : memref<1x1xf32, #tpu.memory_space<smem>>
    %cst = arith.constant 1.000000e+00 : f32
    %1 = arith.divf %cst, %0 : f32
    %c0_1 = arith.constant 0 : index
    %c0_2 = arith.constant 0 : index
    %2 = vector.load %arg3[%c0_1, %c0_2] : memref<8x128xf32, #tpu.memory_space<vmem>>, vector<8x128xf32>
    %3 = vector.broadcast %1 : f32 to vector<8x128xf32>
    %4 = arith.mulf %2, %3 : vector<8x128xf32>
    %c0_3 = arith.constant 0 : index
    %c0_4 = arith.constant 0 : index
    %5 = vector.load %arg4[%c0_3, %c0_4] : memref<8x128xf32, #tpu.memory_space<vmem>>, vector<8x128xf32>
    tpu.vector_store %arg4[%c0_3, %c0_4], %4 {strides = array<i32>} : memref<8x128xf32, #tpu.memory_space<vmem>>, vector<8x128xf32>,
    return
  }
  func.func @transform_0(%arg0: i32, %arg1: i32) -> (i32, i32) {
    %c0_i32 = arith.constant 0 : i32
    %c0_i32_0 = arith.constant 0 : i32
    %c0_i32_1 = arith.constant 0 : i32
    return %c0_i32, %c0_i32_0 : i32, i32
  }
  func.func @transform_1(%arg0: i32, %arg1: i32) -> (i32, i32) {
    %c0_i32 = arith.constant 0 : i32
    return %arg0, %arg1 : i32, i32
  }
  func.func @transform_2(%arg0: i32, %arg1: i32) -> (i32, i32) {
    %c0_i32 = arith.constant 0 : i32
    return %arg0, %arg1 : i32, i32
  }
}

</mosaic_0001>

<bundles_post_ra>
// kernel: tpu_custom_call.1
= control target key start
LH: loop header
LB: loop body
LE: loop exit
PB: predicated region body
PF: predicated region fallthrough
CT: control target
= control target key end

     0   :  { %8 = vsyncpa [#allocation4], 0  ;;  %s149_s0 = inlined_call_operand.<no memory space> [shape: f32[1,1], index: 0, kind: input, shape index: {}]   ;;  %s150_s1 = inlined_call_operand.hbm [shape: f32[8,128], index: 1, kind: input, shape index: {}]   ;;  %s151_s2 = inlined_call_operand.hbm [shape: f32[8,128], index: 2, kind: output, shape index: {}]  }
   0x1   :  { %9 = vsyncpa [#allocation5], 0  ;;  %s17_s11 = sshll.u32 %s150_s1, 4  ;;  %s123_s12 = smov [#allocation3]   ;;  %v28_v0 = vstv %s149_s0  ;;  %s18_s11 = int_to_ptr.hbm [resolvable:$true] %s17_s11 }
   0x2   :  { %s19_s13 = sshll.u32 %s123_s12, 4  ;;  %s20_s13 = int_to_ptr.vmem [resolvable:$true] %s19_s13 }
   0x3   :  { %22 = dma.hbm_to_vmem [thread:$0]  %s18_s11, 128, %s20_s13, [#allocation4]  }
   0x4   :  { %119 = dma.done.wait [#allocation4], 128  }
   0x5   :  { %120 = vsyncadd [#allocation4], 4294967168  ;;  %69 = vrcp.f32 %v28_v0  ;;  %v40_v3 = vand.u32 2147483648, %v28_v0  ;;  %vm34_vm0 = vweird.f32 %v28_v0  ;;  %v38_v5 = vand.u32 2147483647, %v28_v0  ;;  %v44_v11 = vld [vmem:[#allocation3] sm:$0xff] }
   0x6   :  { %s124_s0 = smov [#allocation6]   ;;  %s55_s18 = sshll.u32 %s151_s2, 4  ;;  %s56_s18 = int_to_ptr.hbm [resolvable:$true] %s55_s18 }
   0x7   :  { %v41_v7 = vor.u32 1.1754944e-38, %v40_v3  ;;  %vm39_vm3 = vcmp.eq.f32.partialorder %v38_v5, 8.507059e+37  ;;  %s53_s1 = sshll.u32 %s124_s0, 4  ;;  %s54_s1 = int_to_ptr.vmem [resolvable:$true] %s53_s1 }
   0xb   :  { %v70_v1 = vpop.eup %69 }
   0xc   :  { %v30_v2 = vmul.f32 %v70_v1, %v28_v0  ;;  %vm35_vm1 = vweird.f32 %v70_v1 }
   0xd   :  { %vm36_vm2 = vmor %vm34_vm0, %vm35_vm1 }
   0xe   :  { %v31_v4 = vsub.f32 1.0, %v30_v2 }
  0x10   :  { %v32_v6 = vmul.f32 %v70_v1, %v31_v4 }
  0x12   :  { %v33_v8 = vadd.f32 %v70_v1, %v32_v6 }
  0x14   :  { %v37_v9 = vsel %vm36_vm2, %v70_v1, %v33_v8 }
  0x15   :  { %v42_v10 = vsel %vm39_vm3, %v41_v7, %v37_v9 }
  0x16   :  { %65 = vpush %v42_v10 }
  0x47   :  { %s66_s19 = spop %65 }
  0x48   :  { %v45_v12 = vstv %s66_s19 }
  0x49   :  { %v46_v13 = vmul.f32 %v45_v12, %v44_v11 }
  0x4b   :  { %47 = vst [vmem:[#allocation6] sm:$0xff] %v46_v13 }
  0x4c   :  { %58 = dma.vmem_to_hbm [thread:$0]  %s54_s1, 128, %s56_s18, [#allocation5]  }
  0x4d   :  { %121 = dma.done.wait [#allocation5], 128  }
  0x4e   :  { %122 = vsyncadd [#allocation5], 4294967168 }
  0x4f   :  { %63 = vsyncpa [#allocation4], 1 }
  0x50   :  { %64 = vsyncpa [#allocation5], 1 }

</bundles_post_ra>
